<compile_context>
chip_gen: v5e
topology: v5e:2x2
jax: 0.10.0
libtpu: 0.0.40
codegen_flags: <defaults>
</compile_context>

<pallas_src>
from functools import partial

import jax
import jax.numpy as jnp
from jax import lax
from jax.experimental import pallas as pl
from jax.experimental.pallas import tpu as pltpu


# --------------------------------------------------------------------------
# Kernel
# --------------------------------------------------------------------------
def _additive_attention_kernel(x_ref, w1_ref, b1_ref, w2_ref, m_ref, o_ref, *,
                               mm_dtype, approx_recip):
    # x_ref : (Bb, S, F)  inputs for this block of examples (original dtype)
    # w1_ref: (H, F)      linear1 weight, PyTorch (out, in) layout (mm_dtype)
    # b1_ref: (1, H)      linear1 bias (f32)
    # w2_ref: (O, H)      linear2 weight, PyTorch (out, in) layout (mm_dtype)
    # m_ref : (Bb, S)     mask (0 == pad), f32
    # o_ref : (Bb, O, F)  output
    Bb, S, F = x_ref.shape
    H = w1_ref.shape[0]
    O = w2_ref.shape[0]

    x = x_ref[...]                                     # (Bb, S, F), e.g. f32
    if x.dtype != mm_dtype:
        x = x.astype(mm_dtype)                         # cast in-kernel (no extra HBM pass)
    x2d = x.reshape(Bb * S, F)                         # free relabel (S % 8 == 0)

    # linear1: x @ w1.T  (contract F against w1 dim 1) -> (Bb*S, H), f32 acc.
    h = lax.dot_general(
        x2d, w1_ref[...],
        dimension_numbers=(((1,), (1,)), ((), ())),
        preferred_element_type=jnp.float32)
    h = jnp.tanh(h + b1_ref[...])                      # f32 elementwise / EUP tanh

    # linear2 (no bias), produced directly in lane-dense (Bb, O, S) layout:
    #   score[b,o,s] = sum_h w2[o,h] * h[b,s,h]
    h3 = h.astype(mm_dtype).reshape(Bb, S, H)          # free relabel
    w2b = jnp.broadcast_to(w2_ref[...], (Bb, O, H))    # tiny, hoisted (no inner loop)
    score = lax.dot_general(
        w2b, h3,
        dimension_numbers=(((2,), (2,)), ((0,), (0,))),
        preferred_element_type=jnp.float32)            # (Bb, O, S)

    # masked_fill(mask == 0, -1e9); (Bb, S) mask broadcasts over the O sublanes.
    pad = m_ref[...] < 0.5                             # robust to 0/1 float or bool masks
    score = jnp.where(pad[:, None, :], jnp.float32(-1000000000.0), score)

    # softmax over seq_len (last axis == lanes) in f32.  Fully masked rows give
    # a uniform softmax, matching PyTorch masked_fill + softmax.
    mx = jnp.max(score, axis=-1, keepdims=True)        # (Bb, O, 1) lane reduce
    e = jnp.exp(score - mx)
    denom = jnp.sum(e, axis=-1, keepdims=True)
    if approx_recip:
        att = e * pl.reciprocal(denom, approx=True)    # EUP slot, bf16 path only
    else:
        att = e / denom                                # exact, f32 checking path

    # bmm: out[b,o,f] = sum_s att[b,o,s] * x[b,s,f]; contraction dim S is last
    # on the LHS.  On the bf16 path att carries ~8 mantissa bits (documented).
    out = lax.dot_general(
        att.astype(mm_dtype), x,
        dimension_numbers=(((2,), (1,)), ((0,), (0,))),
        preferred_element_type=jnp.float32)            # (Bb, O, F)
    o_ref[...] = out.astype(o_ref.dtype)


# --------------------------------------------------------------------------
# Block-size / VMEM-budget selection
# --------------------------------------------------------------------------
def _vmem_capacity_bytes():
    try:
        info = pltpu.get_tpu_info()
        cap = getattr(info, "vmem_capacity_bytes", None)
        if cap:
            return int(cap)
    except Exception:
        pass
    return 64 * 1024 * 1024          # conservative default (v7x physical VMEM)


def _block_footprint_bytes(b, S, F, H, O, in_bytes, mm_bytes, out_bytes):
    """Conservative per-step VMEM footprint for a block of b examples."""
    # Pallas double-buffers each pipelined block (input / mask / output).
    x_blk = b * S * F * in_bytes
    m_blk = b * S * 4
    o_blk = b * O * F * out_bytes
    pipelined = 2 * (x_blk + m_blk + o_blk)
    # In-kernel intermediates (assume all live at once -> over-counts, safe).
    inter = (b * S * F * mm_bytes                # x cast for the MXU
             + b * S * H * (4 + mm_bytes)        # h (f32) + cast
             + 3 * b * O * S * 4                 # score / exp / att (f32)
             + b * O * S * mm_bytes              # att cast
             + b * O * F * 4)                    # f32 matmul accumulator
    return pipelined + inter


def _largest_divisor_leq(n, cap):
    cap = max(1, min(int(cap), int(n)))
    for d in range(cap, 0, -1):
        if n % d == 0:
            return d
    return 1


def _choose_block_batch(bz, S, F, H, O, in_bytes, mm_bytes, out_bytes, budget):
    """Pick examples-per-step and the (possibly padded) batch size."""
    per_ex = _block_footprint_bytes(1, S, F, H, O, in_bytes, mm_bytes, out_bytes)
    max_b = max(1, min(bz, int(budget // max(per_ex, 1))))

    # Prefer a divisor of bz: no batch padding, no extra HBM copy of inputs.
    b = _largest_divisor_leq(bz, max_b)

    # If the whole batch collapsed into one step, split it (feeds both v7x
    # TensorCores) only when each step still moves >=1 MiB of input and keeps a
    # healthy matmul M dim, so the ~0.35us/step overhead stays amortised.
    if b == bz and bz > 1:
        d = _largest_divisor_leq(bz, bz // 2)
        if d >= 1 and d * S >= 128 and d * S * F * in_bytes >= (1 << 20):
            b = d

    bz_pad = bz
    # Rare fallback (e.g. large prime batch): the best divisor is far below
    # what VMEM allows -> pad the batch to a near multiple instead.
    if b * 4 < min(max_b, bz):
        steps = pl.cdiv(bz, max_b)
        b = pl.cdiv(bz, steps)
        bz_pad = steps * b
    return b, bz_pad


# --------------------------------------------------------------------------
# Wrapper
# --------------------------------------------------------------------------
def additive_attention(inputs, w1, b1, w2, mask=None, *,
                       mm_dtype=jnp.bfloat16, out_dtype=jnp.float32,
                       block_batch=None):
    """
    inputs: (bz, S, F) float
    w1:     (H, F)  linear1 weight, PyTorch (out, in) layout
    b1:     (H,)    linear1 bias
    w2:     (O, H)  linear2 weight, PyTorch (out, in) layout (no bias)
    mask:   (bz, S) 0 == pad, or None
    returns (bz, O, F) in out_dtype (default float32, matching the module)
    """
    bz, S, F = inputs.shape
    H = w1.shape[0]
    O = w2.shape[0]

    if mask is None:
        mask_f = jnp.ones((bz, S), dtype=jnp.float32)
    else:
        mask_f = mask.astype(jnp.float32)

    x = inputs                       # original dtype; cast happens inside the kernel

    # Keep in-kernel reshapes relabel-free: pad S to a multiple of 8 if ragged.
    # (Padded positions get mask=0 -> excluded from the softmax; note: a fully
    # masked *real* row then normalises over S_pad instead of S — degenerate
    # case only.)
    if S % 8 != 0:
        s_extra = (-S) % 8
        x = jnp.pad(x, ((0, 0), (0, s_extra), (0, 0)))
        mask_f = jnp.pad(mask_f, ((0, 0), (0, s_extra)))
        S = S + s_extra

    in_bytes = jnp.dtype(x.dtype).itemsize
    mm_bytes = jnp.dtype(mm_dtype).itemsize
    out_bytes = jnp.dtype(out_dtype).itemsize

    vmem_cap = _vmem_capacity_bytes()
    budget = min(48 << 20, vmem_cap // 2)     # ~48 MiB on v5e/v6e, ~32 MiB on v7x

    if block_batch is None:
        B_blk, bz_pad = _choose_block_batch(
            bz, S, F, H, O, in_bytes, mm_bytes, out_bytes, budget)
    else:
        B_blk = int(block_batch)
        bz_pad = pl.cdiv(bz, B_blk) * B_blk

    if bz_pad != bz:
        # Fallback only (forced block_batch / pathological bz): padded rows are
        # fully masked -> uniform softmax -> finite output, sliced off below.
        x = jnp.pad(x, ((0, bz_pad - bz), (0, 0), (0, 0)))
        mask_f = jnp.pad(mask_f, ((0, bz_pad - bz), (0, 0)))

    w1_c = jnp.asarray(w1, mm_dtype)                  # (H, F) PyTorch layout
    b1_r = jnp.asarray(b1, jnp.float32).reshape(1, H)
    w2_c = jnp.asarray(w2, mm_dtype)                  # (O, H) PyTorch layout

    # Explicit, generation-aware scoped VMEM limit sized for the chosen block.
    fp = _block_footprint_bytes(B_blk, S, F, H, O, in_bytes, mm_bytes, out_bytes)
    weights_fp = 2 * ((H * F + O * H) * mm_bytes + H * 4)
    vmem_limit = int(min(int(vmem_cap * 0.9),
                         max(fp + weights_fp + (4 << 20), 32 << 20)))

    kernel = partial(
        _additive_attention_kernel,
        mm_dtype=mm_dtype,
        approx_recip=(jnp.dtype(mm_dtype) != jnp.dtype(jnp.float32)))

    out = pl.pallas_call(
        kernel,
        out_shape=jax.ShapeDtypeStruct((bz_pad, O, F), out_dtype),
        grid_spec=pltpu.PrefetchScalarGridSpec(
            num_scalar_prefetch=0,
            grid=(bz_pad // B_blk,),
            in_specs=[
                pl.BlockSpec((B_blk, S, F), lambda i: (i, 0, 0)),   # inputs
                pl.BlockSpec((H, F), lambda i: (0, 0)),             # w1
                pl.BlockSpec((1, H), lambda i: (0, 0)),             # b1
                pl.BlockSpec((O, H), lambda i: (0, 0)),             # w2
                pl.BlockSpec((B_blk, S), lambda i: (i, 0)),         # mask
            ],
            out_specs=pl.BlockSpec((B_blk, O, F), lambda i: (i, 0, 0)),
        ),
        compiler_params=pltpu.CompilerParams(
            dimension_semantics=("parallel",),
            vmem_limit_bytes=vmem_limit,
        ),
    )(x, w1_c, b1_r, w2_c, mask_f)

    return out[:bz] if bz_pad != bz else out


# --------------------------------------------------------------------------
# Reference + tests
# --------------------------------------------------------------------------
def _reference(inputs, w1, b1, w2, mask):
    # Pure-JAX reference mirroring the PyTorch forward (f32).
    h = jnp.tanh(inputs @ w1.T + b1)
    score = jnp.transpose(h @ w2.T, (0, 2, 1))            # (bz, O, S)
    if mask is not None:
        score = jnp.where((mask == 0)[:, None, :], -1000000000.0, score)
    w = jax.nn.softmax(score, axis=-1)
    return jnp.einsum("bos,bsf->bof", w, inputs)


if __name__ == "__main__":
    key = jax.random.PRNGKey(0)

    # --- test 1: toy shapes from the module docstring ---------------------
    bz, S, F, H, O = 2, 8, 32, 16, 8
    k1, k2, k3, k4 = jax.random.split(key, 4)
    inputs = jax.random.normal(k1, (bz, S, F), dtype=jnp.float32)
    w1 = jax.random.uniform(k2, (H, F), minval=-0.1, maxval=0.1, dtype=jnp.float32)
    b1 = jax.random.uniform(k3, (H,), minval=-0.1, maxval=0.1, dtype=jnp.float32)
    w2 = jax.random.uniform(k4, (O, H), minval=-0.1, maxval=0.1, dtype=jnp.float32)
    mask = jnp.ones((bz, S), dtype=jnp.float32).at[1, -2:].set(0.0)

    ref = _reference(inputs, w1, b1, w2, mask)

    # f32 matmul path: exact division -> tight check.
    out_f32 = jax.block_until_ready(
        additive_attention(inputs, w1, b1, w2, mask, mm_dtype=jnp.float32))
    assert out_f32.shape == (bz, O, F)
    assert jnp.allclose(out_f32, ref, atol=1e-3, rtol=1e-3), "f32 path mismatch"

    # bf16 matmul path (default / fast): looser check vs f32 reference.
    out_bf16 = jax.block_until_ready(additive_attention(inputs, w1, b1, w2, mask))
    assert out_bf16.shape == (bz, O, F)
    assert jnp.allclose(out_bf16, ref, atol=5e-2, rtol=5e-2), "bf16 path mismatch"

    # --- test 2: bigger shapes, auto block selection (single big block) ---
    bz2, S2, F2, H2, O2 = 5, 128, 128, 32, 8
    j1, j2, j3, j4 = jax.random.split(jax.random.PRNGKey(1), 4)
    inputs2 = jax.random.normal(j1, (bz2, S2, F2), dtype=jnp.float32)
    w1b = jax.random.uniform(j2, (H2, F2), minval=-0.05, maxval=0.05, dtype=jnp.float32)
    b1b = jax.random.uniform(j3, (H2,), minval=-0.05, maxval=0.05, dtype=jnp.float32)
    w2b = jax.random.uniform(j4, (O2, H2), minval=-0.05, maxval=0.05, dtype=jnp.float32)
    mask2 = (jnp.ones((bz2, S2), dtype=jnp.float32)
             .at[0, 100:].set(0.0)
             .at[3, 64:].set(0.0))

    ref2 = _reference(inputs2, w1b, b1b, w2b, mask2)
    out2 = jax.block_until_ready(additive_attention(inputs2, w1b, b1b, w2b, mask2))
    assert out2.shape == (bz2, O2, F2)
    assert jnp.allclose(out2, ref2, atol=5e-2, rtol=5e-2), "auto-block path mismatch"

    # --- test 3: forced block size exercising the multi-step + pad fallback
    out3 = jax.block_until_ready(
        additive_attention(inputs2, w1b, b1b, w2b, mask2, block_batch=2))
    assert out3.shape == (bz2, O2, F2)
    assert jnp.allclose(out3, ref2, atol=5e-2, rtol=5e-2), "blocked/padded path mismatch"

    print("KERNEL_OK")
</pallas_src>

<mosaic_0001>
module attributes {stable_mosaic.version = 11 : i64} {
  func.func @_additive_attention_kernel(%arg0: i32, %arg1: memref<2x8x32xf32, #tpu.memory_space<vmem>>, %arg2: memref<16x32xf32, #tpu.memory_space<vmem>>, %arg3: memref<1x16xf32, #tpu.memory_space<vmem>>, %arg4: memref<8x16xf32, #tpu.memory_space<vmem>>, %arg5: memref<2x8xf32, #tpu.memory_space<vmem>>, %arg6: memref<2x8x32xf32, #tpu.memory_space<vmem>>) attributes {dimension_semantics = [#tpu.dimension_semantics<parallel>], iteration_bounds = array<i64: 1>, scalar_prefetch = 0 : i64, scratch_operands = 0 : i64, tpu.core_type = #tpu.core_type<tc>, window_params = [{transform_indices = @transform_0, window_bounds = array<i64: 2, 8, 32>}, {pipeline_mode = #tpu.pipeline_mode<synchronous>, transform_indices = @transform_1, window_bounds = array<i64: 16, 32>}, {pipeline_mode = #tpu.pipeline_mode<synchronous>, transform_indices = @transform_2, window_bounds = array<i64: 1, 16>}, {pipeline_mode = #tpu.pipeline_mode<synchronous>, transform_indices = @transform_3, window_bounds = array<i64: 8, 16>}, {transform_indices = @transform_4, window_bounds = array<i64: 2, 8>}, {transform_indices = @transform_5, window_bounds = array<i64: 2, 8, 32>}]} {
    %c0 = arith.constant 0 : index
    %c0_0 = arith.constant 0 : index
    %c0_1 = arith.constant 0 : index
    %0 = vector.load %arg1[%c0, %c0_0, %c0_1] : memref<2x8x32xf32, #tpu.memory_space<vmem>>, vector<2x8x32xf32>
    %1 = vector.shape_cast %0 : vector<2x8x32xf32> to vector<16x32xf32>
    %c0_2 = arith.constant 0 : index
    %c0_3 = arith.constant 0 : index
    %2 = vector.load %arg2[%c0_2, %c0_3] : memref<16x32xf32, #tpu.memory_space<vmem>>, vector<16x32xf32>
    %cst = arith.constant dense<0.000000e+00> : vector<16x16xf32>
    %3 = tpu.matmul %1, %2, %cst {dimension_numbers = #tpu.dot_dimension_numbers<[1], [1], [0], [0], [0, 0, 1, 0], [], []>} : vector<16x32xf32>, vector<16x32xf32>, vector<16x16xf32> -> vector<16x16xf32>
    %c0_4 = arith.constant 0 : index
    %c0_5 = arith.constant 0 : index
    %4 = vector.load %arg3[%c0_4, %c0_5] : memref<1x16xf32, #tpu.memory_space<vmem>>, vector<1x16xf32>
    %5 = vector.broadcast %4 : vector<1x16xf32> to vector<16x16xf32>
    %6 = arith.addf %3, %5 : vector<16x16xf32>
    %7 = math.tanh %6 : vector<16x16xf32>
    %8 = vector.shape_cast %7 : vector<16x16xf32> to vector<2x8x16xf32>
    %c0_6 = arith.constant 0 : index
    %c0_7 = arith.constant 0 : index
    %9 = vector.load %arg4[%c0_6, %c0_7] : memref<8x16xf32, #tpu.memory_space<vmem>>, vector<8x16xf32>
    %10 = vector.shape_cast %9 : vector<8x16xf32> to vector<1x8x16xf32>
    %11 = vector.broadcast %10 : vector<1x8x16xf32> to vector<2x8x16xf32>
    %cst_8 = arith.constant dense<0.000000e+00> : vector<2x8x8xf32>
    %12 = tpu.matmul %11, %8, %cst_8 {dimension_numbers = #tpu.dot_dimension_numbers<[2], [2], [1], [1], [0, 0, 0, 1, 1, 1], [0], [0]>} : vector<2x8x16xf32>, vector<2x8x16xf32>, vector<2x8x8xf32> -> vector<2x8x8xf32>
    %c0_9 = arith.constant 0 : index
    %c0_10 = arith.constant 0 : index
    %13 = vector.load %arg5[%c0_9, %c0_10] : memref<2x8xf32, #tpu.memory_space<vmem>>, vector<2x8xf32>
    %cst_11 = arith.constant 5.000000e-01 : f32
    %14 = vector.broadcast %cst_11 : f32 to vector<2x8xf32>
    %15 = arith.cmpf olt, %13, %14 : vector<2x8xf32>
    %16 = vector.shape_cast %15 : vector<2x8xi1> to vector<2x1x8xi1>
    %cst_12 = arith.constant -1.000000e+09 : f32
    %17 = vector.shape_cast %16 : vector<2x1x8xi1> to vector<2x1x8xi1>
    %18 = vector.broadcast %17 : vector<2x1x8xi1> to vector<2x8x8xi1>
    %19 = vector.broadcast %cst_12 : f32 to vector<2x8x8xf32>
    %20 = arith.select %18, %19, %12 : vector<2x8x8xi1>, vector<2x8x8xf32>
    %cst_13 = arith.constant dense<0xFF800000> : vector<2x8xf32>
    %21 = vector.multi_reduction <maximumf>, %20, %cst_13 [2] : vector<2x8x8xf32> to vector<2x8xf32>
    %22 = vector.shape_cast %21 : vector<2x8xf32> to vector<2x8x1xf32>
    %23 = vector.broadcast %22 : vector<2x8x1xf32> to vector<2x8x8xf32>
    %24 = arith.subf %20, %23 : vector<2x8x8xf32>
    %25 = math.exp %24 : vector<2x8x8xf32>
    %cst_14 = arith.constant dense<0.000000e+00> : vector<2x8xf32>
    %26 = vector.multi_reduction <add>, %25, %cst_14 [2] : vector<2x8x8xf32> to vector<2x8xf32>
    %27 = vector.shape_cast %26 : vector<2x8xf32> to vector<2x8x1xf32>
    %28 = vector.broadcast %27 : vector<2x8x1xf32> to vector<2x8x8xf32>
    %29 = arith.divf %25, %28 : vector<2x8x8xf32>
    %cst_15 = arith.constant dense<0.000000e+00> : vector<2x8x32xf32>
    %30 = tpu.matmul %29, %0, %cst_15 {dimension_numbers = #tpu.dot_dimension_numbers<[2], [1], [1], [2], [0, 0, 0, 1, 1, 2], [0], [0]>} : vector<2x8x8xf32>, vector<2x8x32xf32>, vector<2x8x32xf32> -> vector<2x8x32xf32>
    %c0_16 = arith.constant 0 : index
    %c0_17 = arith.constant 0 : index
    %c0_18 = arith.constant 0 : index
    %31 = vector.load %arg6[%c0_16, %c0_17, %c0_18] : memref<2x8x32xf32, #tpu.memory_space<vmem>>, vector<2x8x32xf32>
    tpu.vector_store %arg6[%c0_16, %c0_17, %c0_18], %30 {strides = array<i32>} : memref<2x8x32xf32, #tpu.memory_space<vmem>>, vector<2x8x32xf32>,
    return
  }
  func.func @transform_0(%arg0: i32) -> (i32, i32, i32) {
    %c0_i32 = arith.constant 0 : i32
    %c0_i32_0 = arith.constant 0 : i32
    %c0_i32_1 = arith.constant 0 : i32
    return %arg0, %c0_i32, %c0_i32_0 : i32, i32, i32
  }
  func.func @transform_1(%arg0: i32) -> (i32, i32) {
    %c0_i32 = arith.constant 0 : i32
    %c0_i32_0 = arith.constant 0 : i32
    %c0_i32_1 = arith.constant 0 : i32
    return %c0_i32, %c0_i32_0 : i32, i32
  }
  func.func @transform_2(%arg0: i32) -> (i32, i32) {
    %c0_i32 = arith.constant 0 : i32
    %c0_i32_0 = arith.constant 0 : i32
    %c0_i32_1 = arith.constant 0 : i32
    return %c0_i32, %c0_i32_0 : i32, i32
  }
  func.func @transform_3(%arg0: i32) -> (i32, i32) {
    %c0_i32 = arith.constant 0 : i32
    %c0_i32_0 = arith.constant 0 : i32
    %c0_i32_1 = arith.constant 0 : i32
    return %c0_i32, %c0_i32_0 : i32, i32
  }
  func.func @transform_4(%arg0: i32) -> (i32, i32) {
    %c0_i32 = arith.constant 0 : i32
    %c0_i32_0 = arith.constant 0 : i32
    return %arg0, %c0_i32 : i32, i32
  }
  func.func @transform_5(%arg0: i32) -> (i32, i32, i32) {
    %c0_i32 = arith.constant 0 : i32
    %c0_i32_0 = arith.constant 0 : i32
    %c0_i32_1 = arith.constant 0 : i32
    return %arg0, %c0_i32, %c0_i32_0 : i32, i32, i32
  }
}

</mosaic_0001>

<bundles_post_ra>
// kernel: tpu_custom_call.1
= control target key start
LH: loop header
LB: loop body
LE: loop exit
PB: predicated region body
PF: predicated region fallthrough
CT: control target
= control target key end

     0   :  { %10 = vsyncpa [#allocation3], 0  ;;  %s500_s0 = inlined_call_operand.hbm [shape: f32[2,8,32], index: 0, kind: input, shape index: {}]   ;;  %s501_s1 = inlined_call_operand.hbm [shape: f32[16,32], index: 1, kind: input, shape index: {}]   ;;  %s502_s2 = inlined_call_operand.vmem [shape: f32[1,16], index: 2, kind: input, shape index: {}]   ;;  %s503_s3 = inlined_call_operand.hbm [shape: f32[8,16], index: 3, kind: input, shape index: {}]   ;;  %s504_s4 = inlined_call_operand.vmem [shape: f32[2,8], index: 4, kind: input, shape index: {}]   ;;  %s505_s5 = inlined_call_operand.hbm [shape: f32[2,8,32], index: 5, kind: output, shape index: {}]  }
   0x1   :  { %11 = vsyncpa [#allocation6], 0 }
   0x2   :  { %12 = vsyncpa [#allocation4], 0  ;;  %s30_s20 = sshll.u32 %s501_s1, 4  ;;  %s424_s21 = smov [#allocation5]   ;;  %s31_s20 = int_to_ptr.hbm [resolvable:$true] %s30_s20 }
   0x3   :  { %s32_s22 = sshll.u32 %s424_s21, 4  ;;  %s17_s25 = sshll.u32 %s500_s0, 4  ;;  %s33_s22 = int_to_ptr.vmem [resolvable:$true] %s32_s22  ;;  %s18_s25 = int_to_ptr.hbm [resolvable:$true] %s17_s25 }
   0x4   :  { %s425_s26 = smov 128   ;;  %s426_s27 = smov 8  }
   0x5   :  { %38 = dma.hbm_to_vmem [thread:$0]  %s31_s20, 256, %s33_s22, [#allocation6], %s425_s26, %s425_s26, %s426_s27  }
   0x6   :  { %s427_s28 = smov [#allocation2]   ;;  %s46_s1 = sshll.u32 %s503_s3, 4  ;;  %s47_s1 = int_to_ptr.hbm [resolvable:$true] %s46_s1 }
   0x7   :  { %s19_s29 = sshll.u32 %s427_s28, 4  ;;  %s428_s0 = smov [#allocation7]   ;;  %s20_s29 = int_to_ptr.vmem [resolvable:$true] %s19_s29 }
   0x8   :  { %25 = dma.hbm_to_vmem [thread:$0]  %s18_s25, 256, %s20_s29, [#allocation3], %s425_s26, %s425_s26, %s426_s27  }
   0x9   :  { %s48_s7 = sshll.u32 %s428_s0, 4  ;;  %s49_s7 = int_to_ptr.vmem [resolvable:$true] %s48_s7 }
   0xa   :  { %51 = dma.hbm_to_vmem [thread:$0]  %s47_s1, 128, %s49_s7, [#allocation6]  }
   0xb   :  { %418 = dma.done.wait [#allocation3], 256  }
   0xc   :  { %419 = vsyncadd [#allocation3], 4294967040 }
   0xd   :  { %420 = dma.done.wait [#allocation6], 384  }
   0xe   :  { %421 = vsyncadd [#allocation6], 4294966912  ;;  %vm74_vm0 = vcmask 261120   ;;  %v69_v0 = vld [vmem:[#allocation5 + $0x8] sm:$0xff]  ;;  %v66_v1 = vld [vmem:[#allocation2] sm:$0xff]  ;;  %vm113_vm1 = vcmask 130048  }
   0xf   :  { %292 = vmatpush.xpose.msk.msra.mxu0 %vm74_vm0, %v69_v0  ;;  %v67_v2 = vld [vmem:[#allocation2 + $0x8] sm:$0xff]  ;;  %242 = vmatpush.msra.mxu3 %v66_v1  ;;  %v68_v3 = vld [vmem:[#allocation5] sm:$0xff]  ;;  %v309_v4 = vld [vmem:[%s502_s2] ss:$0 sm:$0xff]  ;;  %v429_v13 = vmov 0   ;;  %vm175_vm4 = vcmask 64512  }
  0x10   :  { %v112_v10 = vld [vmem:[#allocation7] sm:$0xff]  ;;  %s430_s2 = smov [#allocation8]   ;;  %s278_s13 = sshll.u32 %s505_s5, 4  ;;  %s279_s13 = int_to_ptr.hbm [resolvable:$true] %s278_s13 }
  0x11   :  { %265 = vmatpush.msrb.mxu3 %v67_v2  ;;  %v163_v12 = vld [vmem:[%s504_s4] sm:$0x3]  ;;  %s276_s4 = sshll.u32 %s430_s2, 4  ;;  %s277_s4 = int_to_ptr.vmem [resolvable:$true] %s276_s4 }
  0x12   :  { %vm164_vm2 = vcmp.lt.f32.partialorder %v163_v12, 0.5 }
  0x13   :  { %293 = vmatpush.xpose.msk.msra.mxu0 %vm74_vm0, %v68_v3  ;;  %v165_v14 = vsel %vm164_vm2, 1, %v429_v13 }
  0x14   :  { %v169_v15 = vperm.slane %v165_v14, 0  ;;  %v166_v16 = vrot.slane %v165_v14, 1 }
  0x16   :  { %294 = vmatmul.msk.f32.vlgmr.msra.gmra.mxu0 %vm74_vm0, %v66_v1  ;;  %vm171_vm3 = vcmp.eq.s32.totalorder %v169_v15, 1  ;;  %vm167_vm5 = vcmp.ne.s32.totalorder %v166_v16, 0 }
  0x17   :  { %v168_v20 = vsel %vm167_vm5, 1, %v429_v13 }
  0x18   :  { %v170_v21 = vperm.slane %v168_v20, 0 }
  0x1a   :  { %vm172_vm6 = vcmp.eq.s32.totalorder %v170_v21, 1 }
  0x1e   :  { %295 = vmatmul.msk.f32.gmra.mxu0 %vm74_vm0, %v67_v2 }
  0x93   :  { %v104_v5 = vpop.f32.mrf.mxu0 }
  0x94   :  { %v105_v6 = vadd.f32 %v309_v4, %v104_v5 }
  0x96   :  { %310 = vtanh.f32 %v105_v6 }
  0x9b   :  { %v107_v7 = vpop.f32.mrf.mxu0 }
  0x9c   :  { %v311_v8 = vpop.eup %310  ;;  %v108_v9 = vadd.f32 %v309_v4, %v107_v7 }
  0x9d   :  { %296 = vmatpush.xpose.msk.msra.mxu1 %vm113_vm1, %v311_v8 }
  0x9e   :  { %312 = vtanh.f32 %v108_v9 }
  0xa0   :  { %297 = vmatmul.msk.f32.vlgmr.msra.gmra.mxu1 %vm113_vm1, %v112_v10 }
  0xa4   :  { %v313_v11 = vpop.eup %312 }
  0xa5   :  { %298 = vmatpush.xpose.msk.msra.mxu2 %vm113_vm1, %v313_v11 }
  0xa8   :  { %299 = vmatmul.msk.f32.vlgmr.msra.gmra.mxu2 %vm113_vm1, %v112_v10 }
 0x11d   :  { %v137_v17 = vpop.f32.mrf.mxu1 }
 0x11e   :  { %v173_v18 = vsel %vm171_vm3, -1e+09, %v137_v17 }
 0x11f   :  { %v176_v19 = vsel %vm175_vm4, %v173_v18, -inf }
 0x120   :  { %177 = vmax.xlane.f32.xlu0 %v176_v19 }
 0x12b   :  { %v160_v22 = vpop.f32.mrf.mxu2 }
 0x12c   :  { %v174_v23 = vsel %vm172_vm6, -1e+09, %v160_v22 }
 0x12d   :  { %v179_v24 = vsel %vm175_vm4, %v174_v23, -inf }
 0x12e   :  { %180 = vmax.xlane.f32.xlu0 %v179_v24 }
 0x193   :  { %v178_v25 = vpop.xlane.xlu0 %177 }
 0x194   :  { %v182_v26 = vsub.f32 %v173_v18, %v178_v25 }
 0x196   :  { %v184_v27 = vmul.f32 1.442695, %v182_v26 }
 0x198   :  { %314 = vpow2.f32 %v184_v27 }
 0x19e   :  { %v315_v28 = vpop.eup %314 }
 0x19f   :  { %v188_v29 = vsel %vm175_vm4, %v315_v28, 0.0 }
 0x1a0   :  { %189 = vadd.xlane.f32.xlu1 %v188_v29 }
 0x1a1   :  { %v181_v30 = vpop.xlane.xlu0 %180 }
 0x1a2   :  { %v183_v31 = vsub.f32 %v174_v23, %v181_v30 }
 0x1a4   :  { %v186_v32 = vmul.f32 1.442695, %v183_v31 }
 0x1a6   :  { %316 = vpow2.f32 %v186_v32 }
 0x1ac   :  { %v317_v33 = vpop.eup %316 }
 0x1ad   :  { %v191_v34 = vsel %vm175_vm4, %v317_v33, 0.0 }
 0x1ae   :  { %192 = vadd.xlane.f32.xlu1 %v191_v34 }
 0x213   :  { %v190_v35 = vpop.xlane.xlu1 %189 }
 0x214   :  { %318 = vrcp.f32 %v190_v35  ;;  %v205_v39 = vand.u32 2147483648, %v190_v35  ;;  %v203_v41 = vand.u32 2147483647, %v190_v35  ;;  %vm199_vm8 = vweird.f32 %v190_v35 }
 0x216   :  { %v206_v44 = vor.u32 1.1754944e-38, %v205_v39  ;;  %vm204_vm10 = vcmp.eq.f32.partialorder %v203_v41, 8.507059e+37 }
 0x21a   :  { %v319_v36 = vpop.eup %318 }
 0x21b   :  { %v195_v37 = vmul.f32 %v319_v36, %v190_v35  ;;  %vm200_vm7 = vweird.f32 %v319_v36 }
 0x21c   :  { %vm201_vm9 = vmor %vm199_vm8, %vm200_vm7 }
 0x21d   :  { %v196_v38 = vsub.f32 1.0, %v195_v37 }
 0x21f   :  { %v197_v40 = vmul.f32 %v319_v36, %v196_v38 }
 0x221   :  { %v193_v42 = vpop.xlane.xlu1 %192  ;;  %v198_v43 = vadd.f32 %v319_v36, %v197_v40 }
 0x222   :  { %320 = vrcp.f32 %v193_v42  ;;  %v220_v51 = vand.u32 2147483648, %v193_v42  ;;  %v218_v53 = vand.u32 2147483647, %v193_v42  ;;  %vm214_vm12 = vweird.f32 %v193_v42 }
 0x223   :  { %v202_v45 = vsel %vm201_vm9, %v319_v36, %v198_v43 }
 0x224   :  { %v207_v46 = vsel %vm204_vm10, %v206_v44, %v202_v45  ;;  %v221_v55 = vor.u32 1.1754944e-38, %v220_v51  ;;  %vm219_vm14 = vcmp.eq.f32.partialorder %v218_v53, 8.507059e+37 }
 0x225   :  { %v208_v47 = vmul.f32 %v315_v28, %v207_v46 }
 0x227   :  { %300 = vmatmul.msk.f32.vlgmr.msra.gmra.mxu3 %vm175_vm4, %v208_v47 }
 0x228   :  { %v321_v48 = vpop.eup %320 }
 0x229   :  { %v210_v49 = vmul.f32 %v321_v48, %v193_v42  ;;  %vm215_vm11 = vweird.f32 %v321_v48 }
 0x22a   :  { %vm216_vm13 = vmor %vm214_vm12, %vm215_vm11 }
 0x22b   :  { %v211_v50 = vsub.f32 1.0, %v210_v49 }
 0x22d   :  { %v212_v52 = vmul.f32 %v321_v48, %v211_v50 }
 0x22f   :  { %v213_v54 = vadd.f32 %v321_v48, %v212_v52 }
 0x231   :  { %v217_v56 = vsel %vm216_vm13, %v321_v48, %v213_v54 }
 0x232   :  { %v222_v57 = vsel %vm219_vm14, %v221_v55, %v217_v56 }
 0x233   :  { %v223_v58 = vmul.f32 %v317_v33, %v222_v57 }
 0x235   :  { %301 = vmatmul.msk.f32.vlgmr.msrb.gmra.mxu3 %vm175_vm4, %v223_v58 }
 0x2aa   :  { %v244_v59 = vpop.f32.mrf.mxu3 }
 0x2ab   :  { %270 = vst.msk [vmem:[#allocation8] sm:$0xff] %vm74_vm0, %v244_v59 }
 0x2b8   :  { %v267_v60 = vpop.f32.mrf.mxu3 }
 0x2b9   :  { %271 = vst.msk [vmem:[#allocation8 + $0x8] sm:$0xff] %vm74_vm0, %v267_v60 }
 0x2ba   :  { %284 = dma.vmem_to_hbm [thread:$0]  %s277_s4, 256, %s279_s13, [#allocation4], %s425_s26, %s425_s26, %s426_s27  }
 0x2bb   :  { %422 = dma.done.wait [#allocation4], 256  }
 0x2bc   :  { %423 = vsyncadd [#allocation4], 4294967040 }
 0x2bd   :  { %289 = vsyncpa [#allocation3], 1 }
 0x2be   :  { %290 = vsyncpa [#allocation6], 1 }
 0x2bf   :  { %291 = vsyncpa [#allocation4], 1 }

</bundles_post_ra>
